<compile_context>
chip_gen: v7x
topology: tpu7x:2x2x1
jax: 0.10.0
libtpu: 0.0.40
codegen_flags: <defaults>
</compile_context>

<pallas_src>
import functools

import jax
import jax.numpy as jnp
from jax.experimental import pallas as pl
from jax.experimental.pallas import tpu as pltpu


_SMALL_COPY_BYTES = 1 << 20  # below this, kernel launch overhead dominates


def _make_chunked_copy_kernel(chunk_bounds):
    """Build an HBM->HBM copy kernel issuing one concurrent DMA per chunk.

    chunk_bounds: static tuple of (start, size) slices along the leading dim.
    All DMAs are started before any wait so they are in flight concurrently.
    """

    def kernel(x_hbm_ref, o_hbm_ref, copy_sems):
        copies = []
        for i, (start, size) in enumerate(chunk_bounds):
            cp = pltpu.make_async_copy(
                x_hbm_ref.at[pl.ds(start, size)],
                o_hbm_ref.at[pl.ds(start, size)],
                copy_sems.at[i],
            )
            cp.start()
            copies.append(cp)
        for cp in copies:
            cp.wait()

    return kernel


@jax.jit
def _pallas_copy(x: jax.Array) -> jax.Array:
    """Materialize a distinct copy of `x` via chunked HBM->HBM DMAs."""
    squeeze_back = False
    if x.ndim == 0:
        x = x.reshape(1)
        squeeze_back = True

    lead = x.shape[0]
    nbytes = x.size * jnp.dtype(x.dtype).itemsize

    # Chunk-count heuristic (static at trace time):
    #   >= 8 MiB -> up to 8 concurrent DMAs (helps saturate v6e/v7x HBM),
    #   >= 1 MiB -> up to 4,
    #   smaller  -> 1 (single DMA already at roofline; avoid extra sems).
    if nbytes >= (8 << 20):
        want = 8
    elif nbytes >= (1 << 20):
        want = 4
    else:
        want = 1
    n = max(1, min(want, lead))

    base, rem = divmod(lead, n)
    bounds, start = [], 0
    for i in range(n):
        size = base + (1 if i < rem else 0)
        bounds.append((start, size))
        start += size

    out = pl.pallas_call(
        _make_chunked_copy_kernel(tuple(bounds)),
        out_shape=jax.ShapeDtypeStruct(x.shape, x.dtype),
        # Leave both operands in place (HBM); the kernel moves the full
        # buffer with concurrent DMAs, no VMEM/VPU round trip.
        in_specs=[pl.BlockSpec(memory_space=pl.ANY)],
        out_specs=pl.BlockSpec(memory_space=pl.ANY),
        scratch_shapes=[pltpu.SemaphoreType.DMA((n,))],
    )(x)

    if squeeze_back:
        out = out.reshape(())
    return out


class NNBasePallas:
    """JAX/Pallas analogue of the abstract torch NNBase."""

    def __init__(self, cuda: bool = False):
        # torch.device('cuda:0') / torch.device('cpu') has no Pallas meaning;
        # JAX's default TPU backend plays that role.  Record the flag only.
        self._device = "tpu"
        self._requested_cuda = cuda

    @property
    def device(self):
        return self._device

    def forward(self, x: jax.Array) -> jax.Array:
        """Identity forward (abstract in the reference module).

        JAX arrays are immutable, so returning `x` is the zero-cost identity:
        no HBM traffic, no kernel launch.
        """
        # TODO(synk): abstract in the torch module; identity pass-through is
        # the only semantics the base class defines.
        return x

    def predict(self, x: jax.Array) -> jax.Array:
        # TODO(synk): abstract in the torch module; defined here as forward().
        return self.forward(x)

    def materialize(self, x: jax.Array, force_kernel: bool = False) -> jax.Array:
        """Return a *distinct* buffer holding the same values as `x`.

        Small inputs bypass the Pallas kernel (launch overhead dominates)
        unless force_kernel=True.
        """
        if x.size == 0:
            return x
        nbytes = x.size * jnp.dtype(x.dtype).itemsize
        if not force_kernel and nbytes < _SMALL_COPY_BYTES:
            return x  # identity: immutable, no distinct buffer actually needed
        return _pallas_copy(x)

    def __call__(self, x: jax.Array) -> jax.Array:
        return self.forward(x)


if __name__ == "__main__":
    key = jax.random.PRNGKey(0)
    # Small NCHW input consistent with a typical conv-net base module.
    x = jax.random.normal(key, (2, 4, 16, 16), dtype=jnp.float32)

    model = NNBasePallas(cuda=False)

    # Hot path: identity forward — no kernel, returns the input array.
    out = model(x)
    out = jax.block_until_ready(out)
    assert out.shape == x.shape and out.dtype == x.dtype
    assert bool(jnp.allclose(out, x))

    # Exercise the Pallas copy kernel once (explicit distinct-buffer path).
    copied = model.materialize(x, force_kernel=True)
    copied = jax.block_until_ready(copied)
    assert copied.shape == x.shape and copied.dtype == x.dtype
    assert bool(jnp.array_equal(copied, x))

    print("KERNEL_OK")
</pallas_src>

<mosaic_0001>
module attributes {stable_mosaic.version = 11 : i64} {
  func.func @kernel(%arg0: memref<2x4x16x16xf32, #tpu.memory_space<any>>, %arg1: memref<2x4x16x16xf32, #tpu.memory_space<any>>, %arg2: memref<1x!tpu.dma_semaphore, #tpu.memory_space<semaphore_mem>>) attributes {dimension_semantics = [], scalar_prefetch = 0 : i64, scratch_operands = 1 : i64, tpu.core_type = #tpu.core_type<tc>} {
    %c0_i32 = arith.constant 0 : i32
    %c0_i32_0 = arith.constant 0 : i32
    %c0_i32_1 = arith.constant 0 : i32
    %c0_i32_2 = arith.constant 0 : i32
    %c0_i32_3 = arith.constant 0 : i32
    %0 = tpu.memref_slice %arg0[%c0_i32_0, %c0_i32_1, %c0_i32_2, %c0_i32_3] : memref<2x4x16x16xf32, #tpu.memory_space<any>> -> memref<2x4x16x16xf32, #tpu.memory_space<any>>
    %c0_i32_4 = arith.constant 0 : i32
    %c0_i32_5 = arith.constant 0 : i32
    %c0_i32_6 = arith.constant 0 : i32
    %c0_i32_7 = arith.constant 0 : i32
    %1 = tpu.memref_slice %arg1[%c0_i32_4, %c0_i32_5, %c0_i32_6, %c0_i32_7] : memref<2x4x16x16xf32, #tpu.memory_space<any>> -> memref<2x4x16x16xf32, #tpu.memory_space<any>>
    %2 = tpu.memref_slice %arg2[%c0_i32] : memref<1x!tpu.dma_semaphore, #tpu.memory_space<semaphore_mem>> -> memref<1x!tpu.dma_semaphore, #tpu.memory_space<semaphore_mem>>
    %3 = tpu.memref_squeeze %2 : memref<1x!tpu.dma_semaphore, #tpu.memory_space<semaphore_mem>> -> memref<!tpu.dma_semaphore, #tpu.memory_space<semaphore_mem>>
    tpu.enqueue_dma source(%0 : memref<2x4x16x16xf32, #tpu.memory_space<any>>) target(%1 : memref<2x4x16x16xf32, #tpu.memory_space<any>>) target_semaphore(%3 : memref<!tpu.dma_semaphore, #tpu.memory_space<semaphore_mem>>)
    %c0_i32_8 = arith.constant 0 : i32
    %c0_i32_9 = arith.constant 0 : i32
    %c0_i32_10 = arith.constant 0 : i32
    %c0_i32_11 = arith.constant 0 : i32
    %c0_i32_12 = arith.constant 0 : i32
    %4 = tpu.memref_slice %arg0[%c0_i32_9, %c0_i32_10, %c0_i32_11, %c0_i32_12] : memref<2x4x16x16xf32, #tpu.memory_space<any>> -> memref<2x4x16x16xf32, #tpu.memory_space<any>>
    %c0_i32_13 = arith.constant 0 : i32
    %c0_i32_14 = arith.constant 0 : i32
    %c0_i32_15 = arith.constant 0 : i32
    %c0_i32_16 = arith.constant 0 : i32
    %5 = tpu.memref_slice %arg1[%c0_i32_13, %c0_i32_14, %c0_i32_15, %c0_i32_16] : memref<2x4x16x16xf32, #tpu.memory_space<any>> -> memref<2x4x16x16xf32, #tpu.memory_space<any>>
    %6 = tpu.memref_slice %arg2[%c0_i32_8] : memref<1x!tpu.dma_semaphore, #tpu.memory_space<semaphore_mem>> -> memref<1x!tpu.dma_semaphore, #tpu.memory_space<semaphore_mem>>
    %7 = tpu.memref_squeeze %6 : memref<1x!tpu.dma_semaphore, #tpu.memory_space<semaphore_mem>> -> memref<!tpu.dma_semaphore, #tpu.memory_space<semaphore_mem>>
    tpu.wait_dma2 semaphore(%7 : memref<!tpu.dma_semaphore, #tpu.memory_space<semaphore_mem>>) src(%4 : memref<2x4x16x16xf32, #tpu.memory_space<any>>) dst(%5 : memref<2x4x16x16xf32, #tpu.memory_space<any>>)
    return
  }
}

</mosaic_0001>

<bundles_post_ra>
// kernel: _pallas_copy.1
= control target key start
LH: loop header
LB: loop body
LE: loop exit
PB: predicated region body
PF: predicated region fallthrough
CT: control target
= control target key end

     0   :  { %s36_s6 = smov [#allocation2]   ;;  %s37_s7 = smov [#allocation3]   ;;  %s55_s0 = inlined_call_operand.hbm [shape: f32[2,4,16,16], index: 0, kind: input, shape index: {}]   ;;  %s56_s1 = inlined_call_operand.hbm [shape: f32[2,4,16,16], index: 1, kind: output, shape index: {}]  }
   0x1   :  { %s38_s8 = smov 0  }
   0x2   :  { %18 = dma.general %s55_s0, 2048, %s56_s1, %s36_s6, %s37_s7, [#allocation4], %s38_s8, 0  }
   0x3   :  { %34 = dma.done.wait [#allocation2], 2048 }
   0x4   :  { %35 = vsyncadd [#allocation2], 4294965248 }
   0x5   :  { %24 = vsyncmov [#allocation2] }
   0x8   :  { %s25_s13 = vpop.sfrf %24 }
   0x9   :  { %p30_p0 = scmp.ne.s32.totalorder %s25_s13, 0 }
   0xb   :  { %29 = shalt.err (%p30_p0)  }

</bundles_post_ra>
